<compile_context>
chip_gen: v6e
topology: v6e:2x2x1
jax: 0.10.0
libtpu: 0.0.40
codegen_flags: <defaults>
</compile_context>

<pallas_src>
import jax
import jax.numpy as jnp
from jax.experimental import pallas as pl
from jax.experimental.pallas import tpu as pltpu

_LANE = 128


def _round_up(v, m):
    return ((v + m - 1) // m) * m


def _pick_batch_tile(B, max_tile=512):
    """Batch tile: 16-row aligned (bf16), 1-2 fat grid steps preferred."""
    b16 = _round_up(B, 16)
    if b16 <= max_tile:
        # Prefer a grid of 2 so v7x's two TensorCores both get a tile, while
        # v5e/v6e still only pay ~2 grid-step overheads.
        if b16 >= 64 and b16 % 32 == 0:
            return b16 // 2
        return b16
    return max_tile


def dqn_kernel(x_ref, w_in_ref, w_stack_ref, b_stack_ref, o_ref):
    # Input layer: cast f32 activations -> bf16 in-kernel, MXU matmul with
    # f32 accumulation, bias + ReLU epilogue in f32 (safe on v5e: no bf16 VPU).
    h = jnp.dot(x_ref[...].astype(w_in_ref.dtype), w_in_ref[...],
                preferred_element_type=jnp.float32)
    h = jnp.maximum(h + b_stack_ref[0], 0.0)

    n_stack = w_stack_ref.shape[0]  # n hidden layers + 1 output layer
    # n is small (default 1) -> static Python loop with zero-cost static slices.
    # TODO(synk): switch to lax.fori_loop(..., unroll=True) if n grows beyond ~4.
    for i in range(n_stack - 1):
        h = jnp.dot(h.astype(w_stack_ref.dtype), w_stack_ref[i],
                    preferred_element_type=jnp.float32)
        h = jnp.maximum(h + b_stack_ref[i + 1], 0.0)

    # Output layer (no activation); store only the useful out_size lanes.
    o = jnp.dot(h.astype(w_stack_ref.dtype), w_stack_ref[n_stack - 1],
                preferred_element_type=jnp.float32)
    o = o + b_stack_ref[n_stack]
    o_ref[...] = o[:, :o_ref.shape[1]].astype(o_ref.dtype)


def prepare_params(params, input_size, hidden_size, output_size):
    """ONE-TIME packing (do this at init / model-load time, not per forward):
      * weights stored transposed vs PyTorch, i.e. (in_features, out_features)
      * cast to bf16, hidden dim padded up to a 128-lane multiple
      * hidden + output weights stacked into one tensor; all biases stacked.
    """
    w_in, b_in, w_h, b_h, w_out, b_out = params
    n = w_h.shape[0]
    hp = _round_up(hidden_size, _LANE)
    assert output_size <= hp, "output_size must fit in the padded hidden width"

    w_in_p = (jnp.zeros((input_size, hp), jnp.bfloat16)
              .at[:, :hidden_size].set(w_in.astype(jnp.bfloat16)))

    w_stack = jnp.zeros((n + 1, hp, hp), jnp.bfloat16)
    w_stack = w_stack.at[:n, :hidden_size, :hidden_size].set(w_h.astype(jnp.bfloat16))
    w_stack = w_stack.at[n, :hidden_size, :output_size].set(w_out.astype(jnp.bfloat16))

    b_stack = jnp.zeros((n + 2, 1, hp), jnp.float32)
    b_stack = b_stack.at[0, :, :hidden_size].set(b_in.astype(jnp.float32))
    if n > 0:
        b_stack = b_stack.at[1:n + 1, :, :hidden_size].set(b_h.astype(jnp.float32))
    b_stack = b_stack.at[n + 1, :, :output_size].set(b_out.astype(jnp.float32))

    return (w_in_p, w_stack, b_stack)


def dqn_forward(x, w_in, w_stack, b_stack, *, out_size):
    """DQN forward. x: (B, input_size) f32, packed params from prepare_params.
    Returns (B, out_size) f32."""
    B, in_size = x.shape
    hp = w_in.shape[1]
    n_stack = w_stack.shape[0]
    n_bias = b_stack.shape[0]

    tb = _pick_batch_tile(B)
    b_p = _round_up(B, tb)
    xp = x if b_p == B else jnp.zeros((b_p, in_size), x.dtype).at[:B].set(x)

    grid = (b_p // tb,)
    in_specs = [
        # Batch-tiled input (un-padded K: last block dim == full array dim).
        pl.BlockSpec((tb, in_size), lambda i: (i, 0)),
        # Weights / biases: constant index_maps -> VMEM-resident across tiles.
        pl.BlockSpec((in_size, hp), lambda i: (0, 0)),
        pl.BlockSpec((n_stack, hp, hp), lambda i: (0, 0, 0)),
        pl.BlockSpec((n_bias, 1, hp), lambda i: (0, 0, 0)),
    ]
    out_spec = pl.BlockSpec((tb, out_size), lambda i: (i, 0))

    out = pl.pallas_call(
        dqn_kernel,
        out_shape=jax.ShapeDtypeStruct((b_p, out_size), jnp.float32),
        grid=grid,
        in_specs=in_specs,
        out_specs=out_spec,
        compiler_params=pltpu.CompilerParams(
            dimension_semantics=("parallel",),  # shard batch tiles across v7x TCs
        ),
    )(xp, w_in, w_stack, b_stack)

    return out if b_p == B else out[:B]


def init_params(key, input_size, hidden_size, output_size, n):
    """Deterministic init mimicking torch.nn.Linear default
    (U[-1/sqrt(fan_in), +1/sqrt(fan_in)]). Weights stored transposed (in, out), f32."""
    keys = jax.random.split(key, 6)

    def unif(k, shape, fan_in):
        bound = 1.0 / jnp.sqrt(fan_in)
        return jax.random.uniform(k, shape, jnp.float32, -bound, bound)

    w_in = unif(keys[0], (input_size, hidden_size), input_size)
    b_in = unif(keys[1], (1, hidden_size), input_size)
    w_h = unif(keys[2], (n, hidden_size, hidden_size), hidden_size)
    b_h = unif(keys[3], (n, 1, hidden_size), hidden_size)
    w_out = unif(keys[4], (hidden_size, output_size), hidden_size)
    b_out = unif(keys[5], (1, output_size), hidden_size)
    return (w_in, b_in, w_h, b_h, w_out, b_out)


def dqn_reference(x, params):
    """Pure-JAX reference mirroring the kernel's bf16-weight / f32-accumulate math."""
    w_in, b_in, w_h, b_h, w_out, b_out = params
    h = jnp.dot(x.astype(jnp.bfloat16), w_in.astype(jnp.bfloat16),
                preferred_element_type=jnp.float32)
    h = jnp.maximum(h + b_in, 0.0)
    for i in range(w_h.shape[0]):
        h = jnp.dot(h.astype(jnp.bfloat16), w_h[i].astype(jnp.bfloat16),
                    preferred_element_type=jnp.float32)
        h = jnp.maximum(h + b_h[i], 0.0)
    o = jnp.dot(h.astype(jnp.bfloat16), w_out.astype(jnp.bfloat16),
                preferred_element_type=jnp.float32)
    return o + b_out


if __name__ == "__main__":
    # Small, module-consistent shapes: 4 Pac-Man actions, H = 128 lanes.
    batch = 64
    input_size = 32
    hidden_size = 128
    output_size = 4
    n = 1  # module default: one hidden layer

    key = jax.random.PRNGKey(0)
    k_params, k_x = jax.random.split(key)

    raw_params = init_params(k_params, input_size, hidden_size, output_size, n)
    # One-time packing (would be done at model init / charger_modele time).
    w_in_p, w_stack, b_stack = jax.block_until_ready(
        prepare_params(raw_params, input_size, hidden_size, output_size))

    x = jax.random.normal(k_x, (batch, input_size), jnp.float32)

    fwd = jax.jit(dqn_forward, static_argnames=("out_size",))
    out = jax.block_until_ready(fwd(x, w_in_p, w_stack, b_stack, out_size=output_size))

    ref = dqn_reference(x, raw_params)
    assert out.shape == (batch, output_size), out.shape
    assert jnp.allclose(out, ref, atol=2e-3, rtol=2e-3), "mismatch vs reference"

    # TODO(synk): sauvegarder_modele / charger_modele (torch.save/load checkpointing)
    # has no Pallas equivalent; persist raw params outside the kernel and re-run
    # prepare_params after loading.

    print("KERNEL_OK")
</pallas_src>

<mosaic_0001>
module attributes {stable_mosaic.version = 11 : i64} {
  func.func @dqn_kernel(%arg0: i32, %arg1: memref<32x32xf32, #tpu.memory_space<vmem>>, %arg2: memref<32x128xbf16, #tpu.memory_space<vmem>>, %arg3: memref<2x128x128xbf16, #tpu.memory_space<vmem>>, %arg4: memref<3x1x128xf32, #tpu.memory_space<vmem>>, %arg5: memref<32x4xf32, #tpu.memory_space<vmem>>) attributes {dimension_semantics = [#tpu.dimension_semantics<parallel>], iteration_bounds = array<i64: 2>, scalar_prefetch = 0 : i64, scratch_operands = 0 : i64, tpu.core_type = #tpu.core_type<tc>, window_params = [{transform_indices = @transform_0, window_bounds = array<i64: 32, 32>}, {pipeline_mode = #tpu.pipeline_mode<synchronous>, transform_indices = @transform_1, window_bounds = array<i64: 32, 128>}, {pipeline_mode = #tpu.pipeline_mode<synchronous>, transform_indices = @transform_2, window_bounds = array<i64: 2, 128, 128>}, {pipeline_mode = #tpu.pipeline_mode<synchronous>, transform_indices = @transform_3, window_bounds = array<i64: 3, 1, 128>}, {transform_indices = @transform_4, window_bounds = array<i64: 32, 4>}]} {
    %c0 = arith.constant 0 : index
    %c0_0 = arith.constant 0 : index
    %0 = vector.load %arg1[%c0, %c0_0] : memref<32x32xf32, #tpu.memory_space<vmem>>, vector<32x32xf32>
    %1 = arith.truncf %0 : vector<32x32xf32> to vector<32x32xbf16>
    %c0_1 = arith.constant 0 : index
    %c0_2 = arith.constant 0 : index
    %2 = vector.load %arg2[%c0_1, %c0_2] : memref<32x128xbf16, #tpu.memory_space<vmem>>, vector<32x128xbf16>
    %cst = arith.constant dense<0.000000e+00> : vector<32x128xf32>
    %3 = tpu.matmul %1, %2, %cst {dimension_numbers = #tpu.dot_dimension_numbers<[1], [0], [0], [1], [0, 0, 1, 1], [], []>} : vector<32x32xbf16>, vector<32x128xbf16>, vector<32x128xf32> -> vector<32x128xf32>
    %c0_3 = arith.constant 0 : index
    %c0_4 = arith.constant 0 : index
    %c0_5 = arith.constant 0 : index
    %4 = vector.load %arg4[%c0_3, %c0_4, %c0_5] : memref<3x1x128xf32, #tpu.memory_space<vmem>>, vector<1x1x128xf32>
    %5 = vector.shape_cast %4 : vector<1x1x128xf32> to vector<1x128xf32>
    %6 = vector.broadcast %5 : vector<1x128xf32> to vector<32x128xf32>
    %7 = arith.addf %3, %6 : vector<32x128xf32>
    %cst_6 = arith.constant 0.000000e+00 : f32
    %8 = vector.broadcast %cst_6 : f32 to vector<32x128xf32>
    %9 = arith.maximumf %7, %8 : vector<32x128xf32>
    %10 = arith.truncf %9 : vector<32x128xf32> to vector<32x128xbf16>
    %c0_7 = arith.constant 0 : index
    %c0_8 = arith.constant 0 : index
    %c0_9 = arith.constant 0 : index
    %11 = vector.load %arg3[%c0_7, %c0_8, %c0_9] : memref<2x128x128xbf16, #tpu.memory_space<vmem>>, vector<1x128x128xbf16>
    %12 = vector.shape_cast %11 : vector<1x128x128xbf16> to vector<128x128xbf16>
    %cst_10 = arith.constant dense<0.000000e+00> : vector<32x128xf32>
    %13 = tpu.matmul %10, %12, %cst_10 {dimension_numbers = #tpu.dot_dimension_numbers<[1], [0], [0], [1], [0, 0, 1, 1], [], []>} : vector<32x128xbf16>, vector<128x128xbf16>, vector<32x128xf32> -> vector<32x128xf32>
    %c1 = arith.constant 1 : index
    %c0_11 = arith.constant 0 : index
    %c0_12 = arith.constant 0 : index
    %14 = vector.load %arg4[%c1, %c0_11, %c0_12] : memref<3x1x128xf32, #tpu.memory_space<vmem>>, vector<1x1x128xf32>
    %15 = vector.shape_cast %14 : vector<1x1x128xf32> to vector<1x128xf32>
    %16 = vector.broadcast %15 : vector<1x128xf32> to vector<32x128xf32>
    %17 = arith.addf %13, %16 : vector<32x128xf32>
    %cst_13 = arith.constant 0.000000e+00 : f32
    %18 = vector.broadcast %cst_13 : f32 to vector<32x128xf32>
    %19 = arith.maximumf %17, %18 : vector<32x128xf32>
    %20 = arith.truncf %19 : vector<32x128xf32> to vector<32x128xbf16>
    %c1_14 = arith.constant 1 : index
    %c0_15 = arith.constant 0 : index
    %c0_16 = arith.constant 0 : index
    %21 = vector.load %arg3[%c1_14, %c0_15, %c0_16] : memref<2x128x128xbf16, #tpu.memory_space<vmem>>, vector<1x128x128xbf16>
    %22 = vector.shape_cast %21 : vector<1x128x128xbf16> to vector<128x128xbf16>
    %cst_17 = arith.constant dense<0.000000e+00> : vector<32x128xf32>
    %23 = tpu.matmul %20, %22, %cst_17 {dimension_numbers = #tpu.dot_dimension_numbers<[1], [0], [0], [1], [0, 0, 1, 1], [], []>} : vector<32x128xbf16>, vector<128x128xbf16>, vector<32x128xf32> -> vector<32x128xf32>
    %c2 = arith.constant 2 : index
    %c0_18 = arith.constant 0 : index
    %c0_19 = arith.constant 0 : index
    %24 = vector.load %arg4[%c2, %c0_18, %c0_19] : memref<3x1x128xf32, #tpu.memory_space<vmem>>, vector<1x1x128xf32>
    %25 = vector.shape_cast %24 : vector<1x1x128xf32> to vector<1x128xf32>
    %26 = vector.broadcast %25 : vector<1x128xf32> to vector<32x128xf32>
    %27 = arith.addf %23, %26 : vector<32x128xf32>
    %28 = vector.extract_strided_slice %27 {offsets = [0, 0], sizes = [32, 4], strides = [1, 1]} : vector<32x128xf32> to vector<32x4xf32>
    %c0_20 = arith.constant 0 : index
    %c0_21 = arith.constant 0 : index
    %29 = vector.load %arg5[%c0_20, %c0_21] : memref<32x4xf32, #tpu.memory_space<vmem>>, vector<32x4xf32>
    tpu.vector_store %arg5[%c0_20, %c0_21], %28 {strides = array<i32>} : memref<32x4xf32, #tpu.memory_space<vmem>>, vector<32x4xf32>,
    return
  }
  func.func @transform_0(%arg0: i32) -> (i32, i32) {
    %c0_i32 = arith.constant 0 : i32
    %c0_i32_0 = arith.constant 0 : i32
    return %arg0, %c0_i32 : i32, i32
  }
  func.func @transform_1(%arg0: i32) -> (i32, i32) {
    %c0_i32 = arith.constant 0 : i32
    %c0_i32_0 = arith.constant 0 : i32
    %c0_i32_1 = arith.constant 0 : i32
    return %c0_i32, %c0_i32_0 : i32, i32
  }
  func.func @transform_2(%arg0: i32) -> (i32, i32, i32) {
    %c0_i32 = arith.constant 0 : i32
    %c0_i32_0 = arith.constant 0 : i32
    %c0_i32_1 = arith.constant 0 : i32
    %c0_i32_2 = arith.constant 0 : i32
    return %c0_i32, %c0_i32_0, %c0_i32_1 : i32, i32, i32
  }
  func.func @transform_3(%arg0: i32) -> (i32, i32, i32) {
    %c0_i32 = arith.constant 0 : i32
    %c0_i32_0 = arith.constant 0 : i32
    %c0_i32_1 = arith.constant 0 : i32
    %c0_i32_2 = arith.constant 0 : i32
    return %c0_i32, %c0_i32_0, %c0_i32_1 : i32, i32, i32
  }
  func.func @transform_4(%arg0: i32) -> (i32, i32) {
    %c0_i32 = arith.constant 0 : i32
    %c0_i32_0 = arith.constant 0 : i32
    return %arg0, %c0_i32 : i32, i32
  }
}

</mosaic_0001>

<bundles_post_ra>
// kernel: dqn_forward.1
= control target key start
LH: loop header
LB: loop body
LE: loop exit
PB: predicated region body
PF: predicated region fallthrough
CT: control target
= control target key end

     0   :  { %9 = vsyncpa [#allocation3], 0  ;;  %s845_s15 = smov 0   ;;  %s905_s0 = inlined_call_operand.vmem [shape: f32[64,32], index: 0, kind: input, shape index: {}]   ;;  %s906_s1 = inlined_call_operand.vmem [shape: bf16[32,128], index: 1, kind: input, shape index: {}]   ;;  %s907_s2 = inlined_call_operand.hbm [shape: bf16[2,128,128], index: 2, kind: input, shape index: {}]   ;;  %s908_s3 = inlined_call_operand.vmem [shape: f32[3,1,128], index: 3, kind: input, shape index: {}]   ;;  %s909_s4 = inlined_call_operand.vmem [shape: f32[64,4], index: 4, kind: output, shape index: {}]  }
   0x1 LB: > { %s630_s16 = sadd.s32 4294967295, %s815_s15   ;;  %p632_p0 = scmp.ge.s32.totalorder %s815_s15, 1  ;;  %s815_s15 = sphi %s845_s15, %s15_s15  }
   0x2   : > { %p135_p1 = scmp.lt.s32.totalorder %s815_s15, 3  ;;  %s817_s17 = smov [#allocation2]  }
   0x3   : > { %s150_s18 = sshll.u32 %s817_s17, 4  ;;  %p857_p3 = scmp.eq.s32.totalorder %s630_s16, 0  ;;  %s151_s18 = int_to_ptr.vmem [resolvable:$true] %s150_s18 }
   0x4   : > { %p853_p2 = pnand %p632_p0, %p135_p1  ;;  %s790_s21 = scalar_lea.vmem %s151_s18, 2048 }
   0x5   : > { %p791_p7 = scmp.ne.s32.totalorder %s151_s18, %s790_s21  ;;  %p798_p10 = scmp.lt.s32.totalorder %s151_s18, %s151_s18 }
   0x6   : > { %p744_p4 = pneg %p853_p2  ;;  %p799_p11 = scmp.lt.s32.totalorder %s790_s21, %s790_s21 }
   0x8   : > { %p745_p5 = pnand %p857_p3, %p744_p4  ;;  %p800_p12 = por %p799_p11, %p798_p10 }
   0xa   : > { %p781_p6 = pneg %p745_p5 }
   0xc   : > { %p793_p8 = pnand %p791_p7, %p781_p6 }
   0xe   : > { %p794_p9 = pneg %p793_p8 }
  0x10   : > { %p801_p13 = pnand %p800_p12, %p794_p9 }
  0x12   : > { %804 = shalt.err (!%p801_p13)
}
  0x13   : > { %s818_s22 = smov 64   ;;  %s819_s23 = smov 4  }
  0x14   : > { %747 = dma.hbm_to_vmem [thread:$0]  (!%p745_p5), %s907_s2, 2048, %s151_s18, [#allocation3], %s818_s22, %s818_s22, %s819_s23  }
  0x15   : > { %178 = sbr.rel (%p853_p2) target bundleno = 651 (0x28b), region = 36 }
  0x1a   : > { %810 = dma.done.wait (%p857_p3), [#allocation3], 2048  }
  0x1b   : > { %812 = vsyncadd (%p857_p3), [#allocation3], 4294965248  ;;  %s637_s26 = sshll.u32 %s630_s16, 2  ;;  %v761_v0 = vld [vmem:[%s906_s1 + $0x8] sm:$0xff]   ;;  %v762_v1 = vld [vmem:[%s906_s1] sm:$0xff]   ;;  %vm246_vm0 = vcmask 261120  }
  0x1c   : > { %p205_p0 = scmp.lt.s32.totalorder %s637_s26, 7  ;;  %692 = vmatprep.subr.bf16.mxu0 %v761_v0  ;;  %v763_v7 = vld [vmem:[#allocation2 + $0x38] sm:$0xff]   ;;  %v764_v8 = vld [vmem:[#allocation2 + $0x30] sm:$0xff]   ;;  %v765_v10 = vld [vmem:[#allocation2 + $0x28] sm:$0xff]   ;;  %vm557_vm1 = vcmask 31744  }
  0x1d   : > { %693 = vmatpush3.bf16.msra.mxu0 %v761_v0  ;;  %700 = vmatprep.subr.bf16.mxu1 %v763_v7  ;;  %v766_v11 = vld [vmem:[#allocation2 + $0x20] sm:$0xff]   ;;  %v767_v12 = vld [vmem:[#allocation2 + $0x18] sm:$0xff]   ;;  %v768_v13 = vld [vmem:[#allocation2 + $0x10] sm:$0xff]  }
  0x1e   : > { %s913_s26 = smov (!%p205_p0, %s637_s26), 7  ;;  %694 = vmatprep.subr.bf16.mxu0 %v762_v1  ;;  %701 = vmatpush3.bf16.msra.mxu1 %v763_v7  ;;  %v769_v14 = vld [vmem:[#allocation2 + $0x8] sm:$0xff]   ;;  %v770_v15 = vld [vmem:[#allocation2] sm:$0xff]   ;;  %v771_v16 = vld [vmem:[#allocation2 + $0x78] sm:$0xff]  }
  0x1f   : > { %s638_s27 = sshll.u32 %s913_s26, 3  ;;  %702 = vmatprep.subr.bf16.mxu1 %v764_v8  ;;  %v772_v17 = vld [vmem:[#allocation2 + $0x70] sm:$0xff]   ;;  %v773_v18 = vld [vmem:[#allocation2 + $0x68] sm:$0xff]   ;;  %v774_v19 = vld [vmem:[#allocation2 + $0x60] sm:$0xff]  }
  0x20   : > { %s208_s30 = scalar_lea.vmem %s905_s0, %s638_s27  ;;  %v775_v20 = vld [vmem:[#allocation2 + $0x58] sm:$0xff]   ;;  %v641_v23 = vld [vmem:[%s908_s3] ss:$0 sm:$0xff]  ;;  %v776_v36 = vld [vmem:[#allocation2 + $0x50] sm:$0xff]   ;;  %s214_s16 = scalar_lea.vmem %s909_s4, %s638_s27 }
  0x21   : > { %v217_v2 = vld [vmem:[%s208_s30] sm:$0xff]  ;;  %v218_v3 = vld [vmem:[%s208_s30 + $0x8] sm:$0xff]  ;;  %v219_v4 = vld [vmem:[%s208_s30 + $0x10] sm:$0xff]  ;;  %695 = vmatpush3.bf16.msra.mxu0 %v762_v1 }
  0x22   : > { %v221_v5 = vpack.c.bf16 %v218_v3, %v217_v2  ;;  %v220_v6 = vld [vmem:[%s208_s30 + $0x18] sm:$0xff]  ;;  %703 = vmatpush3.bf16.msra.mxu1 %v764_v8  ;;  %720 = vmatprep.subr.bf16.mxu0 %v771_v16  ;;  %v777_v37 = vld [vmem:[#allocation2 + $0x48] sm:$0xff]   ;;  %v778_v38 = vld [vmem:[#allocation2 + $0x40] sm:$0xff]  }
  0x23   : > { %v222_v9 = vpack.c.bf16 %v220_v6, %v219_v4  ;;  %704 = vmatprep.subr.bf16.mxu1 %v765_v10  ;;  %v647_v41 = vld [vmem:[%s908_s3 + $0x1] ss:$0 sm:$0xff]  ;;  %v657_v55 = vld [vmem:[%s908_s3 + $0x2] ss:$0 sm:$0xff] }
  0x24   : > { %696 = vmatprep.mubr.msk.bf16.mxu0 %vm246_vm0, %v221_v5 }
  0x25   : > { %697 = vmatmul.mubr.msk.bf16.vlgmr.msra.gmra.mxu0 %vm246_vm0, %v222_v9 }
  0x26   : > { %705 = vmatpush3.bf16.msra.mxu1 %v765_v10  ;;  %721 = vmatpush3.bf16.msra.mxu0 %v771_v16 }
  0x27   : > { %706 = vmatprep.subr.bf16.mxu1 %v766_v11  ;;  %722 = vmatprep.subr.bf16.mxu0 %v772_v17 }
  0x2a   : > { %707 = vmatpush3.bf16.msra.mxu1 %v766_v11  ;;  %723 = vmatpush3.bf16.msra.mxu0 %v772_v17 }
  0x2b   : > { %708 = vmatprep.subr.bf16.mxu1 %v767_v12  ;;  %724 = vmatprep.subr.bf16.mxu0 %v773_v18 }
  0x2e   : > { %709 = vmatpush3.bf16.msra.mxu1 %v767_v12  ;;  %725 = vmatpush3.bf16.msra.mxu0 %v773_v18 }
  0x2f   : > { %710 = vmatprep.subr.bf16.mxu1 %v768_v13  ;;  %726 = vmatprep.subr.bf16.mxu0 %v774_v19 }
  0x32   : > { %711 = vmatpush3.bf16.msra.mxu1 %v768_v13  ;;  %727 = vmatpush3.bf16.msra.mxu0 %v774_v19 }
  0x33   : > { %712 = vmatprep.subr.bf16.mxu1 %v769_v14  ;;  %728 = vmatprep.subr.bf16.mxu0 %v775_v20 }
  0x36   : > { %713 = vmatpush3.bf16.msra.mxu1 %v769_v14  ;;  %729 = vmatpush3.bf16.msra.mxu0 %v775_v20 }
  0x37   : > { %714 = vmatprep.subr.bf16.mxu1 %v770_v15  ;;  %730 = vmatprep.subr.bf16.mxu0 %v776_v36 }
  0x3a   : > { %715 = vmatpush3.bf16.msra.mxu1 %v770_v15  ;;  %731 = vmatpush3.bf16.msra.mxu0 %v776_v36 }
  0x3b   : > { %732 = vmatprep.subr.bf16.mxu0 %v777_v37 }
  0x3e   : > { %733 = vmatpush3.bf16.msra.mxu0 %v777_v37 }
  0x3f   : > { %734 = vmatprep.subr.bf16.mxu0 %v778_v38 }
  0x42   : > { %735 = vmatpush3.bf16.msra.mxu0 %v778_v38 }
  0xe5   : > { %v698_v21 = vpop.f32.mrf.mxu0 }
  0xe6   : > { %v296_v27 = vadd.f32 %v698_v21, %v641_v23 }
  0xe7   : > { %v287_v22 = vpop.f32.mrf.mxu0 }
  0xe8   : > { %v288_v25 = vadd.f32 %v641_v23, %v287_v22  ;;  %v304_v33 = vmax.f32 %v296_v27, 0.0 }
  0xe9   : > { %v699_v24 = vpop.f32.mrf.mxu0 }
  0xea   : > { %v299_v26 = vadd.f32 %v699_v24, %v641_v23  ;;  %v302_v31 = vmax.f32 %v288_v25, 0.0 }
  0xeb   : > { %v290_v28 = vpop.f32.mrf.mxu0 }
  0xec   : > { %v291_v29 = vadd.f32 %v641_v23, %v290_v28  ;;  %v305_v30 = vmax.f32 %v299_v26, 0.0 }
  0xee   : > { %v303_v32 = vmax.f32 %v291_v29, 0.0  ;;  %v307_v35 = vpack.c.bf16 %v305_v30, %v304_v33 }
  0xf0   : > { %v306_v34 = vpack.c.bf16 %v303_v32, %v302_v31 }
  0xf2   : > { %716 = vmatprep.mubr.bf16.mxu1 %v306_v34 }
  0xf3   : > { %717 = vmatmul.mubr.bf16.vlgmr.msra.gmra.mxu1 %v307_v35 }
 0x1b3   : > { %v718_v39 = vpop.f32.mrf.mxu1 }
 0x1b4   : > { %v423_v45 = vadd.f32 %v718_v39, %v647_v41 }
 0x1b5   : > { %v414_v40 = vpop.f32.mrf.mxu1 }
 0x1b6   : > { %v415_v43 = vadd.f32 %v647_v41, %v414_v40  ;;  %v431_v51 = vmax.f32 %v423_v45, 0.0 }
 0x1b7   : > { %v719_v42 = vpop.f32.mrf.mxu1 }
 0x1b8   : > { %v426_v44 = vadd.f32 %v719_v42, %v647_v41  ;;  %v429_v49 = vmax.f32 %v415_v43, 0.0 }
 0x1b9   : > { %v417_v46 = vpop.f32.mrf.mxu1 }
 0x1ba   : > { %v418_v47 = vadd.f32 %v647_v41, %v417_v46  ;;  %v432_v48 = vmax.f32 %v426_v44, 0.0 }
 0x1bc   : > { %v430_v50 = vmax.f32 %v418_v47, 0.0  ;;  %v434_v53 = vpack.c.bf16 %v432_v48, %v431_v51 }
 0x1be   : > { %v433_v52 = vpack.c.bf16 %v430_v50, %v429_v49 }
 0x1c0   : > { %736 = vmatprep.mubr.bf16.mxu0 %v433_v52 }
 0x1c1   : > { %737 = vmatmul.mubr.bf16.vlgmr.msra.gmra.mxu0 %v434_v53 }
 0x281   : > { %v738_v54 = vpop.f32.mrf.mxu0 }
 0x282   : > { %v551_v61 = vadd.f32 %v738_v54, %v657_v55 }
 0x283   : > { %v542_v56 = vpop.f32.mrf.mxu0 }
 0x284   : > { %v543_v57 = vadd.f32 %v657_v55, %v542_v56  ;;  %560 = vst.msk [vmem:[%s214_s16 + $0x10] sm:$0xff] %vm557_vm1, %v551_v61 }
 0x285   : > { %v739_v58 = vpop.f32.mrf.mxu0 }
 0x286   : > { %558 = vst.msk [vmem:[%s214_s16] sm:$0xff] %vm557_vm1, %v543_v57  ;;  %v554_v62 = vadd.f32 %v739_v58, %v657_v55 }
 0x287   : > { %v545_v59 = vpop.f32.mrf.mxu0 }
 0x288   : > { %v546_v60 = vadd.f32 %v657_v55, %v545_v59  ;;  %561 = vst.msk [vmem:[%s214_s16 + $0x18] sm:$0xff] %vm557_vm1, %v554_v62 }
 0x28a   : > { %559 = vst.msk [vmem:[%s214_s16 + $0x8] sm:$0xff] %vm557_vm1, %v546_v60 }
 0x28b PF: > { %s15_s15 = sadd.s32 1, %s815_s15  }
 0x28c   : > { %p12_p1 = scmp.ge.s32.totalorder %s15_s15, 4  }
 0x28e   :  { %14 = sbr.rel (!%p12_p1) target bundleno = 1 (0x1), region = 74 }
 0x293   :  { %584 = vsyncpa [#allocation3], 1 }
 0x294   :  { %586 = vsyncpa [#allocation3 + $0x1], 1 }

</bundles_post_ra>
